<compile_context>
chip_gen: v7x
topology: tpu7x:2x2x1
jax: 0.10.0
libtpu: 0.0.40
codegen_flags: <defaults>
</compile_context>

<pallas_src>
import jax
import jax.numpy as jnp
from jax.experimental import pallas as pl
from jax.experimental.pallas import tpu as pltpu


def _conv3x3_banded_kernel(x_ref, w_ref, b_ref, o_ref):
    # x_ref: (TN, H+2, (W+2)*Cin)   zero-padded input rows, (width, Cin) flattened
    # w_ref: (3, (W+2)*Cin, W*Cout) banded weights, one band per kh tap
    # b_ref: (1, W*Cout)            bias tiled across width (float32)
    # o_ref: (TN, H, W*Cout)        lane-dense output
    TN, Hout, WC = o_ref.shape
    bias_row = b_ref[...].astype(jnp.float32)            # (1, W*Cout), hoisted
    for b in range(TN):                                   # small static unroll
        acc = jnp.zeros((Hout, WC), dtype=jnp.float32)
        for kh in range(3):                               # 3 lane-dense matmuls
            acc += jnp.dot(x_ref[b, kh:kh + Hout, :], w_ref[kh],
                           preferred_element_type=jnp.float32)
        o_ref[b] = (acc + bias_row).astype(o_ref.dtype)


def _banded_conv_weights(weight_oihw, W, dtype):
    """(Cout, Cin, 3, 3) -> (3, (W+2)*Cin, W*Cout) banded matrices.

    B[kh, (w+kw)*Cin + ci, w*Cout + co] = weight[co, ci, kh, kw]; zeros elsewhere.
    """
    Cout, Cin, KH, KW = weight_oihw.shape
    assert KH == 3 and KW == 3
    w_t = jnp.transpose(weight_oihw, (2, 3, 1, 0)).astype(dtype)   # (3,3,Cin,Cout)
    Wp2 = W + 2
    B = jnp.zeros((3, Wp2 * Cin, W * Cout), dtype=dtype)
    w_idx = jnp.arange(W)
    rows_base = w_idx[:, None] * Cin + jnp.arange(Cin)[None, :]    # (W, Cin)
    cols = w_idx[:, None] * Cout + jnp.arange(Cout)[None, :]       # (W, Cout)
    for kh in range(3):
        for kw in range(3):
            rows = rows_base + kw * Cin                            # (W, Cin)
            vals = jnp.broadcast_to(w_t[kh, kw][None, :, :], (W, Cin, Cout))
            B = B.at[kh, rows[:, :, None], cols[:, None, :]].set(vals)
    return B


def mixed_op_forward(x_nchw, weight_oihw, bias, *, batch_tile=None,
                     compute_dtype=jnp.float32):
    """MixedOp forward: y = conv3x3(x, weight) + bias, stride 1, pad 1 (NCHW)."""
    N, Cin, H, W = x_nchw.shape
    Cout = weight_oihw.shape[0]
    Wp2C = (W + 2) * Cin
    WC = W * Cout

    # One-time layout glue: NCHW -> padded NHWC with (width, Cin) flattened.
    x_nhwc = jnp.transpose(x_nchw, (0, 2, 3, 1))
    x_pad = jnp.pad(x_nhwc, ((0, 0), (1, 1), (1, 1), (0, 0)))
    x_flat = x_pad.reshape(N, H + 2, Wp2C).astype(compute_dtype)

    w_band = _banded_conv_weights(weight_oihw, W, compute_dtype)   # (3, Wp2C, WC)
    b_flat = jnp.tile(bias, W).reshape(1, WC).astype(jnp.float32)

    if batch_tile is None:
        batch_tile = next((t for t in (8, 4, 2, 1) if N % t == 0), 1)
    TN = batch_tile
    assert N % TN == 0
    grid = (N // TN,)

    itemsize = jnp.dtype(compute_dtype).itemsize
    out_itemsize = jnp.dtype(x_nchw.dtype).itemsize
    cost = pl.CostEstimate(
        flops=2 * N * H * W * 9 * Cin * Cout,
        transcendentals=0,
        bytes_accessed=(x_flat.size + w_band.size) * itemsize
                       + N * H * WC * out_itemsize
                       + b_flat.size * 4,
    )

    out = pl.pallas_call(
        _conv3x3_banded_kernel,
        out_shape=jax.ShapeDtypeStruct((N, H, WC), x_nchw.dtype),
        grid_spec=pltpu.PrefetchScalarGridSpec(
            num_scalar_prefetch=0,
            grid=grid,
            in_specs=[
                pl.BlockSpec((TN, H + 2, Wp2C), lambda n: (n, 0, 0)),
                pl.BlockSpec((3, Wp2C, WC), lambda n: (0, 0, 0)),
                pl.BlockSpec((1, WC), lambda n: (0, 0)),
            ],
            out_specs=pl.BlockSpec((TN, H, WC), lambda n: (n, 0, 0)),
        ),
        compiler_params=pltpu.CompilerParams(
            dimension_semantics=("parallel",)),
        cost_estimate=cost,
    )(x_flat, w_band, b_flat)

    # (N, H, W*Cout) -> NCHW
    out = out.reshape(N, H, W, Cout)
    return jnp.transpose(out, (0, 3, 1, 2))


if __name__ == "__main__":
    # Small, deterministic example consistent with the module (nf channels, square spatial).
    N, nf, H, W = 2, 8, 16, 16
    key = jax.random.PRNGKey(0)
    kx, kwt, kb = jax.random.split(key, 3)
    x = jax.random.normal(kx, (N, nf, H, W), dtype=jnp.float32)
    weight = jax.random.normal(kwt, (nf, nf, 3, 3), dtype=jnp.float32) * 0.05
    bias = jax.random.normal(kb, (nf,), dtype=jnp.float32) * 0.05

    y = mixed_op_forward(x, weight, bias)
    y = jax.block_until_ready(y)

    # Reference check against XLA's conv (NCHW, OIHW, pad=1, stride=1).
    y_ref = jax.lax.conv_general_dilated(
        x, weight, window_strides=(1, 1), padding=((1, 1), (1, 1)),
        dimension_numbers=("NCHW", "OIHW", "NCHW"),
    ) + bias[None, :, None, None]
    assert y.shape == (N, nf, H, W)
    assert jnp.max(jnp.abs(y - y_ref)) < 2e-4

    print("KERNEL_OK")
</pallas_src>

<mosaic_0001>
module attributes {stable_mosaic.version = 11 : i64} {
  func.func @_conv3x3_banded_kernel(%arg0: i32, %arg1: memref<2x18x144xf32, #tpu.memory_space<vmem>>, %arg2: memref<3x144x128xf32, #tpu.memory_space<vmem>>, %arg3: memref<1x128xf32, #tpu.memory_space<vmem>>, %arg4: memref<2x16x128xf32, #tpu.memory_space<vmem>>) attributes {dimension_semantics = [#tpu.dimension_semantics<parallel>], iteration_bounds = array<i64: 1>, scalar_prefetch = 0 : i64, scratch_operands = 0 : i64, tpu.core_type = #tpu.core_type<tc>, window_params = [{transform_indices = @transform_0, window_bounds = array<i64: 2, 18, 144>}, {pipeline_mode = #tpu.pipeline_mode<synchronous>, transform_indices = @transform_1, window_bounds = array<i64: 3, 144, 128>}, {pipeline_mode = #tpu.pipeline_mode<synchronous>, transform_indices = @transform_2, window_bounds = array<i64: 1, 128>}, {transform_indices = @transform_3, window_bounds = array<i64: 2, 16, 128>}]} {
    %c0 = arith.constant 0 : index
    %c0_0 = arith.constant 0 : index
    %0 = vector.load %arg3[%c0, %c0_0] : memref<1x128xf32, #tpu.memory_space<vmem>>, vector<1x128xf32>
    %cst = arith.constant 0.000000e+00 : f32
    %1 = vector.broadcast %cst : f32 to vector<16x128xf32>
    %c0_1 = arith.constant 0 : index
    %c0_2 = arith.constant 0 : index
    %c0_3 = arith.constant 0 : index
    %2 = vector.load %arg1[%c0_1, %c0_2, %c0_3] : memref<2x18x144xf32, #tpu.memory_space<vmem>>, vector<1x16x144xf32>
    %3 = vector.shape_cast %2 : vector<1x16x144xf32> to vector<16x144xf32>
    %c0_4 = arith.constant 0 : index
    %c0_5 = arith.constant 0 : index
    %c0_6 = arith.constant 0 : index
    %4 = vector.load %arg2[%c0_4, %c0_5, %c0_6] : memref<3x144x128xf32, #tpu.memory_space<vmem>>, vector<1x144x128xf32>
    %5 = vector.shape_cast %4 : vector<1x144x128xf32> to vector<144x128xf32>
    %cst_7 = arith.constant dense<0.000000e+00> : vector<16x128xf32>
    %6 = tpu.matmul %3, %5, %cst_7 {dimension_numbers = #tpu.dot_dimension_numbers<[1], [0], [0], [1], [0, 0, 1, 1], [], []>} : vector<16x144xf32>, vector<144x128xf32>, vector<16x128xf32> -> vector<16x128xf32>
    %7 = arith.addf %1, %6 : vector<16x128xf32>
    %c0_8 = arith.constant 0 : index
    %c1 = arith.constant 1 : index
    %c0_9 = arith.constant 0 : index
    %8 = vector.load %arg1[%c0_8, %c1, %c0_9] : memref<2x18x144xf32, #tpu.memory_space<vmem>>, vector<1x16x144xf32>
    %9 = vector.shape_cast %8 : vector<1x16x144xf32> to vector<16x144xf32>
    %c1_10 = arith.constant 1 : index
    %c0_11 = arith.constant 0 : index
    %c0_12 = arith.constant 0 : index
    %10 = vector.load %arg2[%c1_10, %c0_11, %c0_12] : memref<3x144x128xf32, #tpu.memory_space<vmem>>, vector<1x144x128xf32>
    %11 = vector.shape_cast %10 : vector<1x144x128xf32> to vector<144x128xf32>
    %cst_13 = arith.constant dense<0.000000e+00> : vector<16x128xf32>
    %12 = tpu.matmul %9, %11, %cst_13 {dimension_numbers = #tpu.dot_dimension_numbers<[1], [0], [0], [1], [0, 0, 1, 1], [], []>} : vector<16x144xf32>, vector<144x128xf32>, vector<16x128xf32> -> vector<16x128xf32>
    %13 = arith.addf %7, %12 : vector<16x128xf32>
    %c0_14 = arith.constant 0 : index
    %c2 = arith.constant 2 : index
    %c0_15 = arith.constant 0 : index
    %14 = vector.load %arg1[%c0_14, %c2, %c0_15] : memref<2x18x144xf32, #tpu.memory_space<vmem>>, vector<1x16x144xf32>
    %15 = vector.shape_cast %14 : vector<1x16x144xf32> to vector<16x144xf32>
    %c2_16 = arith.constant 2 : index
    %c0_17 = arith.constant 0 : index
    %c0_18 = arith.constant 0 : index
    %16 = vector.load %arg2[%c2_16, %c0_17, %c0_18] : memref<3x144x128xf32, #tpu.memory_space<vmem>>, vector<1x144x128xf32>
    %17 = vector.shape_cast %16 : vector<1x144x128xf32> to vector<144x128xf32>
    %cst_19 = arith.constant dense<0.000000e+00> : vector<16x128xf32>
    %18 = tpu.matmul %15, %17, %cst_19 {dimension_numbers = #tpu.dot_dimension_numbers<[1], [0], [0], [1], [0, 0, 1, 1], [], []>} : vector<16x144xf32>, vector<144x128xf32>, vector<16x128xf32> -> vector<16x128xf32>
    %19 = arith.addf %13, %18 : vector<16x128xf32>
    %20 = vector.broadcast %0 : vector<1x128xf32> to vector<16x128xf32>
    %21 = arith.addf %19, %20 : vector<16x128xf32>
    %c0_20 = arith.constant 0 : index
    %c0_21 = arith.constant 0 : index
    %c0_22 = arith.constant 0 : index
    %22 = vector.load %arg4[%c0_20, %c0_21, %c0_22] : memref<2x16x128xf32, #tpu.memory_space<vmem>>, vector<1x16x128xf32>
    %23 = vector.shape_cast %22 : vector<1x16x128xf32> to vector<16x128xf32>
    %24 = vector.shape_cast %21 : vector<16x128xf32> to vector<1x16x128xf32>
    tpu.vector_store %arg4[%c0_20, %c0_21, %c0_22], %24 {strides = array<i32>} : memref<2x16x128xf32, #tpu.memory_space<vmem>>, vector<1x16x128xf32>,
    %cst_23 = arith.constant 0.000000e+00 : f32
    %25 = vector.broadcast %cst_23 : f32 to vector<16x128xf32>
    %c1_24 = arith.constant 1 : index
    %c0_25 = arith.constant 0 : index
    %c0_26 = arith.constant 0 : index
    %26 = vector.load %arg1[%c1_24, %c0_25, %c0_26] : memref<2x18x144xf32, #tpu.memory_space<vmem>>, vector<1x16x144xf32>
    %27 = vector.shape_cast %26 : vector<1x16x144xf32> to vector<16x144xf32>
    %c0_27 = arith.constant 0 : index
    %c0_28 = arith.constant 0 : index
    %c0_29 = arith.constant 0 : index
    %28 = vector.load %arg2[%c0_27, %c0_28, %c0_29] : memref<3x144x128xf32, #tpu.memory_space<vmem>>, vector<1x144x128xf32>
    %29 = vector.shape_cast %28 : vector<1x144x128xf32> to vector<144x128xf32>
    %cst_30 = arith.constant dense<0.000000e+00> : vector<16x128xf32>
    %30 = tpu.matmul %27, %29, %cst_30 {dimension_numbers = #tpu.dot_dimension_numbers<[1], [0], [0], [1], [0, 0, 1, 1], [], []>} : vector<16x144xf32>, vector<144x128xf32>, vector<16x128xf32> -> vector<16x128xf32>
    %31 = arith.addf %25, %30 : vector<16x128xf32>
    %c1_31 = arith.constant 1 : index
    %c1_32 = arith.constant 1 : index
    %c0_33 = arith.constant 0 : index
    %32 = vector.load %arg1[%c1_31, %c1_32, %c0_33] : memref<2x18x144xf32, #tpu.memory_space<vmem>>, vector<1x16x144xf32>
    %33 = vector.shape_cast %32 : vector<1x16x144xf32> to vector<16x144xf32>
    %c1_34 = arith.constant 1 : index
    %c0_35 = arith.constant 0 : index
    %c0_36 = arith.constant 0 : index
    %34 = vector.load %arg2[%c1_34, %c0_35, %c0_36] : memref<3x144x128xf32, #tpu.memory_space<vmem>>, vector<1x144x128xf32>
    %35 = vector.shape_cast %34 : vector<1x144x128xf32> to vector<144x128xf32>
    %cst_37 = arith.constant dense<0.000000e+00> : vector<16x128xf32>
    %36 = tpu.matmul %33, %35, %cst_37 {dimension_numbers = #tpu.dot_dimension_numbers<[1], [0], [0], [1], [0, 0, 1, 1], [], []>} : vector<16x144xf32>, vector<144x128xf32>, vector<16x128xf32> -> vector<16x128xf32>
    %37 = arith.addf %31, %36 : vector<16x128xf32>
    %c1_38 = arith.constant 1 : index
    %c2_39 = arith.constant 2 : index
    %c0_40 = arith.constant 0 : index
    %38 = vector.load %arg1[%c1_38, %c2_39, %c0_40] : memref<2x18x144xf32, #tpu.memory_space<vmem>>, vector<1x16x144xf32>
    %39 = vector.shape_cast %38 : vector<1x16x144xf32> to vector<16x144xf32>
    %c2_41 = arith.constant 2 : index
    %c0_42 = arith.constant 0 : index
    %c0_43 = arith.constant 0 : index
    %40 = vector.load %arg2[%c2_41, %c0_42, %c0_43] : memref<3x144x128xf32, #tpu.memory_space<vmem>>, vector<1x144x128xf32>
    %41 = vector.shape_cast %40 : vector<1x144x128xf32> to vector<144x128xf32>
    %cst_44 = arith.constant dense<0.000000e+00> : vector<16x128xf32>
    %42 = tpu.matmul %39, %41, %cst_44 {dimension_numbers = #tpu.dot_dimension_numbers<[1], [0], [0], [1], [0, 0, 1, 1], [], []>} : vector<16x144xf32>, vector<144x128xf32>, vector<16x128xf32> -> vector<16x128xf32>
    %43 = arith.addf %37, %42 : vector<16x128xf32>
    %44 = vector.broadcast %0 : vector<1x128xf32> to vector<16x128xf32>
    %45 = arith.addf %43, %44 : vector<16x128xf32>
    %c1_45 = arith.constant 1 : index
    %c0_46 = arith.constant 0 : index
    %c0_47 = arith.constant 0 : index
    %46 = vector.load %arg4[%c1_45, %c0_46, %c0_47] : memref<2x16x128xf32, #tpu.memory_space<vmem>>, vector<1x16x128xf32>
    %47 = vector.shape_cast %46 : vector<1x16x128xf32> to vector<16x128xf32>
    %48 = vector.shape_cast %45 : vector<16x128xf32> to vector<1x16x128xf32>
    tpu.vector_store %arg4[%c1_45, %c0_46, %c0_47], %48 {strides = array<i32>} : memref<2x16x128xf32, #tpu.memory_space<vmem>>, vector<1x16x128xf32>,
    return
  }
  func.func @transform_0(%arg0: i32) -> (i32, i32, i32) {
    %c0_i32 = arith.constant 0 : i32
    %c0_i32_0 = arith.constant 0 : i32
    %c0_i32_1 = arith.constant 0 : i32
    return %arg0, %c0_i32, %c0_i32_0 : i32, i32, i32
  }
  func.func @transform_1(%arg0: i32) -> (i32, i32, i32) {
    %c0_i32 = arith.constant 0 : i32
    %c0_i32_0 = arith.constant 0 : i32
    %c0_i32_1 = arith.constant 0 : i32
    %c0_i32_2 = arith.constant 0 : i32
    return %c0_i32, %c0_i32_0, %c0_i32_1 : i32, i32, i32
  }
  func.func @transform_2(%arg0: i32) -> (i32, i32) {
    %c0_i32 = arith.constant 0 : i32
    %c0_i32_0 = arith.constant 0 : i32
    %c0_i32_1 = arith.constant 0 : i32
    return %c0_i32, %c0_i32_0 : i32, i32
  }
  func.func @transform_3(%arg0: i32) -> (i32, i32, i32) {
    %c0_i32 = arith.constant 0 : i32
    %c0_i32_0 = arith.constant 0 : i32
    %c0_i32_1 = arith.constant 0 : i32
    return %arg0, %c0_i32, %c0_i32_0 : i32, i32, i32
  }
}

</mosaic_0001>

<bundles_post_ra>
// kernel: tpu_custom_call.1
= control target key start
LH: loop header
LB: loop body
LE: loop exit
PB: predicated region body
PF: predicated region fallthrough
CT: control target
= control target key end

     0   :  { %8 = vsyncpa [#allocation3], 0  ;;  %s1340_s0 = inlined_call_operand.vmem [shape: f32[2,18,144], index: 0, kind: input, shape index: {}]   ;;  %s1341_s1 = inlined_call_operand.hbm [shape: f32[3,144,128], index: 1, kind: input, shape index: {}]   ;;  %s1342_s2 = inlined_call_operand.vmem [shape: f32[1,128], index: 2, kind: input, shape index: {}]   ;;  %s1343_s3 = inlined_call_operand.hbm [shape: f32[2,16,128], index: 3, kind: output, shape index: {}]  }
   0x1   :  { %9 = vsyncpa [#allocation4], 0  ;;  %s988_s12 = smov [#allocation2]   ;;  %s940_s16 = scalar_lea.hbm %s1341_s1, 6912 }
   0x2   :  { %s17_s13 = sshll.u32 %s988_s12, 4  ;;  %p941_p0 = scmp.ne.s32.totalorder %s1341_s1, %s940_s16  ;;  %s18_s13 = int_to_ptr.vmem [resolvable:$true] %s17_s13 }
   0x3   :  { %p944_p1 = scmp.lt.u32.totalorder %s940_s16, %s1341_s1 }
   0x5   :  { %p946_p2 = pnand %p944_p1, %p941_p0 }
   0x7   :  { %949 = shalt.err (!%p946_p2)
}
   0x8   :  { %s950_s21 = scalar_lea.vmem %s18_s13, 6912  ;;  %p955_p4 = scmp.lt.s32.totalorder %s18_s13, %s18_s13 }
   0x9   :  { %p951_p3 = scmp.ne.s32.totalorder %s18_s13, %s950_s21  ;;  %p956_p5 = scmp.lt.s32.totalorder %s950_s21, %s950_s21 }
   0xb   :  { %p957_p6 = por %p956_p5, %p955_p4 }
   0xd   :  { %p958_p7 = pnand %p957_p6, %p951_p3 }
   0xf   :  { %961 = shalt.err (!%p958_p7)
}
  0x10   :  { %s989_s22 = smov 128   ;;  %s990_s23 = smov 8  }
  0x11   :  { %23 = dma.hbm_to_vmem [thread:$0]  %s1341_s1, 6912, %s18_s13, [#allocation3], %s989_s22, %s989_s22, %s990_s23  }
  0x12   :  { %984 = dma.done.wait [#allocation3], 6912  }
  0x13   :  { %985 = vsyncadd [#allocation3], 4294960384  ;;  %v991_v0 = vmov 0.0|0.0   ;;  %v57_v1 = vld [vmem:[#allocation2 + $0x90] sm:$0xff]  ;;  %v58_v2 = vld [vmem:[#allocation2 + $0x98] sm:$0xff]  ;;  %vm94_vm0 = vcmask 130048  }
  0x14   :  { %773 = vmatprep.subr.bf16.mxu0 %v991_v0  ;;  %800 = vmatprep.subr.bf16.mxu1 %v991_v0  ;;  %v34_v3 = vld [vmem:[#allocation2] sm:$0xff]  ;;  %v1030_v4 = vpack.c.bf16 %v58_v2, %v57_v1  ;;  %v35_v5 = vld [vmem:[#allocation2 + $0x8] sm:$0xff]  ;;  %v36_v9 = vld [vmem:[#allocation2 + $0x10] sm:$0xff]  ;;  %vm81_vm1 = vcmask 1046528   ;;  %vm281_vm2 = vcmask 1045504  }
  0x15   :  { %v59_v6 = vld [vmem:[#allocation2 + $0xa0] sm:$0xff]  ;;  %v60_v7 = vld [vmem:[#allocation2 + $0xa8] sm:$0xff]  ;;  %v1032_v8 = vpack.c.bf16 %v35_v5, %v34_v3  ;;  %v37_v10 = vld [vmem:[#allocation2 + $0x18] sm:$0xff] }
  0x16   :  { %775 = vmatpush1.bf16.msra.mxu0 %v1030_v4  ;;  %v1035_v11 = vpack.c.bf16 %v60_v7, %v59_v6  ;;  %v1039_v12 = vpack.c.bf16 %v37_v10, %v36_v9  ;;  %v61_v13 = vld [vmem:[#allocation2 + $0xb0] sm:$0xff]  ;;  %v62_v14 = vld [vmem:[#allocation2 + $0xb8] sm:$0xff]  ;;  %v38_v15 = vld [vmem:[#allocation2 + $0x20] sm:$0xff] }
  0x17   :  { %802 = vmatpush1.bf16.msra.mxu1 %v1032_v8  ;;  %776 = vmatprep.subr.bf16.mxu0 %v991_v0  ;;  %v39_v16 = vld [vmem:[#allocation2 + $0x28] sm:$0xff]  ;;  %v1043_v17 = vpack.c.bf16 %v62_v14, %v61_v13  ;;  %v63_v19 = vld [vmem:[#allocation2 + $0xc0] sm:$0xff]  ;;  %v40_v21 = vld [vmem:[#allocation2 + $0x30] sm:$0xff] }
  0x18   :  { %803 = vmatprep.subr.bf16.mxu1 %v991_v0  ;;  %v1047_v18 = vpack.c.bf16 %v39_v16, %v38_v15  ;;  %v64_v20 = vld [vmem:[#allocation2 + $0xc8] sm:$0xff]  ;;  %v41_v22 = vld [vmem:[#allocation2 + $0x38] sm:$0xff]  ;;  %v65_v24 = vld [vmem:[#allocation2 + $0xd0] sm:$0xff] }
  0x19   :  { %v1051_v23 = vpack.c.bf16 %v64_v20, %v63_v19  ;;  %v1055_v25 = vpack.c.bf16 %v41_v22, %v40_v21  ;;  %v66_v26 = vld [vmem:[#allocation2 + $0xd8] sm:$0xff]  ;;  %v53_v28 = vld [vmem:[%s1340_s0 + $0x8] sm:$0xfe]  ;;  %v42_v29 = vld [vmem:[#allocation2 + $0x40] sm:$0xff] }
  0x1a   :  { %778 = vmatpush1.bf16.msra.mxu0 %v1035_v11  ;;  %v1060_v27 = vld [vmem:[%s1340_s0 + $0x18] sm:$0xff]  ;;  %v43_v30 = vld [vmem:[#allocation2 + $0x48] sm:$0xff]  ;;  %v85_v31 = vrot.slane %v53_v28, 1  ;;  %v1072_v34 = vpack.c.bf16 %v66_v26, %v65_v24  ;;  %v67_v37 = vld [vmem:[#allocation2 + $0xe0] sm:$0xff] }
  0x1b   :  { %805 = vmatpush1.bf16.msra.mxu1 %v1039_v12  ;;  %779 = vmatprep.subr.bf16.mxu0 %v991_v0  ;;  %v86_v32 = vrot.slane %v1060_v27, 1  ;;  %v31_v33 = vld [vmem:[%s1340_s0 + $0x8] sm:$0xff]  ;;  %v1079_v36 = vpack.c.bf16 %v43_v30, %v42_v29  ;;  %v44_v39 = vld [vmem:[#allocation2 + $0x50] sm:$0xff]  ;;  %v45_v40 = vld [vmem:[#allocation2 + $0x58] sm:$0xff]  ;;  %v286_v26 = vrot.slane %v1060_v27, 2 }
  0x1c   :  { %806 = vmatprep.subr.bf16.mxu1 %v991_v0  ;;  %750 = vmatprep.mubr.msk.f32.mxu1 %vm94_vm0, %v31_v33  ;;  %v68_v38 = vld [vmem:[#allocation2 + $0xe8] sm:$0xff]  ;;  %v1088_v42 = vpack.c.bf16 %v45_v40, %v44_v39  ;;  %v69_v43 = vld [vmem:[#allocation2 + $0xf0] sm:$0xff]  ;;  %v70_v44 = vld [vmem:[#allocation2 + $0xf8] sm:$0xff] }
  0x1d   :  { %v87_v35 = vsel %vm81_vm1, %v85_v31, %v86_v32  ;;  %v1084_v41 = vpack.c.bf16 %v68_v38, %v67_v37  ;;  %v46_v45 = vld [vmem:[#allocation2 + $0x60] sm:$0xff]  ;;  %v47_v46 = vld [vmem:[#allocation2 + $0x68] sm:$0xff]  ;;  %v1092_v47 = vpack.c.bf16 %v70_v44, %v69_v43  ;;  %v48_v51 = vld [vmem:[#allocation2 + $0x70] sm:$0xff] }
  0x1e   :  { %781 = vmatpush1.bf16.msra.mxu0 %v1043_v17  ;;  %748 = vmatprep.mubr.msk.f32.mxu0 %vm94_vm0, %v87_v35  ;;  %v1096_v48 = vpack.c.bf16 %v47_v46, %v46_v45  ;;  %v71_v49 = vld [vmem:[#allocation2 + $0x100] sm:$0xff]  ;;  %v72_v50 = vld [vmem:[#allocation2 + $0x108] sm:$0xff]  ;;  %v49_v52 = vld [vmem:[#allocation2 + $0x78] sm:$0xff] }
  0x1f   :  { %808 = vmatpush1.bf16.msra.mxu1 %v1047_v18  ;;  %782 = vmatprep.subr.bf16.mxu0 %v991_v0  ;;  %v1100_v53 = vpack.c.bf16 %v72_v50, %v71_v49  ;;  %v73_v54 = vld [vmem:[#allocation2 + $0x110] sm:$0xff]  ;;  %v1104_v55 = vpack.c.bf16 %v49_v52, %v48_v51  ;;  %v74_v56 = vld [vmem:[#allocation2 + $0x118] sm:$0xff]  ;;  %v52_v58 = vld [vmem:[%s1340_s0] sm:$0xfe] }
  0x20   :  { %809 = vmatprep.subr.bf16.mxu1 %v991_v0  ;;  %v1109_v57 = vld [vmem:[%s1340_s0 + $0x10] sm:$0xff]  ;;  %v50_v59 = vld [vmem:[#allocation2 + $0x80] sm:$0xff]  ;;  %v51_v60 = vld [vmem:[#allocation2 + $0x88] sm:$0xff]  ;;  %v1116_v61 = vpack.c.bf16 %v74_v56, %v73_v54  ;;  %v82_v62 = vrot.slane %v52_v58, 1 }
  0x21   :  { %v83_v63 = vrot.slane %v1109_v57, 1  ;;  %v55_v1 = vld [vmem:[%s1340_s0 + $0x28] sm:$0x1]  ;;  %v1124_v2 = vpack.c.bf16 %v51_v60, %v50_v59  ;;  %v259_v3 = vld [vmem:[#allocation2 + $0x120] sm:$0xff]  ;;  %v261_v14 = vld [vmem:[#allocation2 + $0x130] sm:$0xff] }
  0x22   :  { %784 = vmatpush1.bf16.msra.mxu0 %v1051_v23  ;;  %v260_v5 = vld [vmem:[#allocation2 + $0x128] sm:$0xff]  ;;  %v54_v6 = vld [vmem:[%s1340_s0 + $0x20] sm:$0x1]  ;;  %v90_v7 = vrot.slane %v55_v1, 1  ;;  %v262_v19 = vld [vmem:[#allocation2 + $0x138] sm:$0xff] }
  0x23   :  { %811 = vmatpush1.bf16.msra.mxu1 %v1055_v25  ;;  %785 = vmatprep.subr.bf16.mxu0 %v991_v0  ;;  %v84_v9 = vsel %vm81_vm1, %v82_v62, %v83_v63  ;;  %v30_v10 = vld [vmem:[%s1340_s0] sm:$0xff]  ;;  %v1135_v13 = vpack.c.bf16 %v260_v5, %v259_v3  ;;  %v88_v15 = vrot.slane %v54_v6, 1  ;;  %v255_v16 = vld [vmem:[%s1340_s0 + $0x8] sm:$0xfc]  ;;  %v760_v21 = vld [vmem:[%s1340_s0 + $0x38] sm:$0xfe]  ;;  %v1156_v28 = vpack.c.bf16 %v262_v19, %v261_v14 }
  0x24   :  { %812 = vmatprep.subr.bf16.mxu1 %v991_v0  ;;  %v1145_v20 = vld [vmem:[%s1340_s0 + $0x48] sm:$0xff]  ;;  %v91_v22 = vsel %vm81_vm1, %v86_v32, %v90_v7  ;;  %v285_v24 = vrot.slane %v255_v16, 2  ;;  %v439_v30 = vrot.slane %v760_v21, 1  ;;  %v263_v33 = vld [vmem:[#allocation2 + $0x140] sm:$0xff]  ;;  %v265_v38 = vld [vmem:[#allocation2 + $0x150] sm:$0xff] }
  0x25   :  { %v89_v29 = vsel %vm81_vm1, %v83_v63, %v88_v15  ;;  %v440_v31 = vrot.slane %v1145_v20, 1  ;;  %v264_v32 = vld [vmem:[#allocation2 + $0x148] sm:$0xff]  ;;  %v266_v39 = vld [vmem:[#allocation2 + $0x158] sm:$0xff]  ;;  %v267_v43 = vld [vmem:[#allocation2 + $0x160] sm:$0xff]  ;;  %v283_v63 = vrot.slane %v1109_v57, 2 }
  0x26   :  { %787 = vmatpush1.bf16.msra.mxu0 %v1072_v34  ;;  %v287_v35 = vsel %vm281_vm2, %v285_v24, %v286_v26  ;;  %v1170_v37 = vpack.c.bf16 %v264_v32, %v263_v33  ;;  %v1182_v40 = vpack.c.bf16 %v266_v39, %v265_v38  ;;  %v269_v45 = vld [vmem:[#allocation2 + $0x170] sm:$0xff]  ;;  %v270_v46 = vld [vmem:[#allocation2 + $0x178] sm:$0xff]  ;;  %v271_v49 = vld [vmem:[#allocation2 + $0x180] sm:$0xff]  ;;  %v637_v24 = vrot.slane %v1145_v20, 2 }
  0x27   :  { %814 = vmatpush1.bf16.msra.mxu1 %v1079_v36  ;;  %788 = vmatprep.subr.bf16.mxu0 %v991_v0  ;;  %v272_v50 = vld [vmem:[#allocation2 + $0x188] sm:$0xff]  ;;  %v273_v51 = vld [vmem:[#allocation2 + $0x190] sm:$0xff]  ;;  %v274_v52 = vld [vmem:[#allocation2 + $0x198] sm:$0xff] }
  0x28   :  { %815 = vmatprep.subr.bf16.mxu1 %v991_v0  ;;  %v275_v54 = vld [vmem:[#allocation2 + $0x1a0] sm:$0xff]  ;;  %v276_v56 = vld [vmem:[#allocation2 + $0x1a8] sm:$0xff]  ;;  %v759_v59 = vld [vmem:[%s1340_s0 + $0x30] sm:$0xfe] }
  0x29   :  { %v1217_v58 = vld [vmem:[%s1340_s0 + $0x40] sm:$0xff]  ;;  %v1226_v60 = vpack.c.bf16 %v276_v56, %v275_v54  ;;  %v436_v1 = vrot.slane %v759_v59, 1  ;;  %v762_v6 = vld [vmem:[%s1340_s0 + $0x58] sm:$0x1]  ;;  %v768_v16 = vld [vmem:[%s1340_s0 + $0x38] sm:$0xfc] }
  0x2a   :  { %790 = vmatpush1.bf16.msra.mxu0 %v1084_v41  ;;  %v437_v3 = vrot.slane %v1217_v58, 1  ;;  %v256_v5 = vld [vmem:[%s1340_s0 + $0x20] sm:$0x3] }
  0x2b   :  { %817 = vmatpush1.bf16.msra.mxu1 %v1088_v42  ;;  %791 = vmatprep.subr.bf16.mxu0 %v991_v0 }
  0x2c   :  { %818 = vmatprep.subr.bf16.mxu1 %v991_v0  ;;  %v438_v14 = vsel %vm81_vm1, %v436_v1, %v437_v3 }
  0x2e   :  { %793 = vmatpush1.bf16.msra.mxu0 %v1092_v47 }
  0x2f   :  { %820 = vmatpush1.bf16.msra.mxu1 %v1096_v48  ;;  %794 = vmatprep.subr.bf16.mxu0 %v991_v0 }
  0x30   :  { %821 = vmatprep.subr.bf16.mxu1 %v991_v0 }
  0x32   :  { %796 = vmatpush1.bf16.msra.mxu0 %v1100_v53 }
  0x33   :  { %823 = vmatpush1.bf16.msra.mxu1 %v1104_v55  ;;  %797 = vmatprep.subr.bf16.mxu0 %v991_v0 }
  0x34   :  { %824 = vmatprep.subr.bf16.mxu1 %v991_v0 }
  0x36   :  { %799 = vmatpush1.bf16.msra.mxu0 %v1116_v61 }
  0x37   :  { %826 = vmatpush1.bf16.msra.mxu1 %v1124_v2  ;;  %827 = vmatprep.subr.bf16.mxu0 %v991_v0 }
  0x38   :  { %854 = vmatprep.subr.bf16.mxu1 %v991_v0 }
  0x39   :  { %164 = vmatmul.mubr.f32.vlgmr.msra.gmra.mrb[0].mxu0 %v84_v9  ;;  %v288_v9 = vrot.slane %v256_v5, 2 }
  0x3a   :  { %244 = vmatmul.mubr.f32.vlgmr.msra.gmra.mrb[0].mxu1 %v30_v10  ;;  %829 = vmatpush1.bf16.msra.mxu0 %v1135_v13  ;;  %v444_v10 = vrot.slane %v762_v6, 1 }
  0x3b   :  { %856 = vmatpush1.bf16.msra.mxu1 %v1030_v4  ;;  %830 = vmatprep.subr.bf16.mxu0 %v991_v0  ;;  %v441_v4 = vsel %vm81_vm1, %v439_v30, %v440_v31 }
  0x3c   :  { %857 = vmatprep.subr.bf16.mxu1 %v991_v0  ;;  %749 = vmatprep.mubr.msk.f32.mxu0 %vm94_vm0, %v91_v22  ;;  %v445_v21 = vsel %vm81_vm1, %v440_v31, %v444_v10  ;;  %v636_v22 = vrot.slane %v768_v16, 2 }
  0x3d   :  { %169 = vmatmul.mubr.f32.gmra.mrb[2].mxu0 %v89_v29  ;;  %751 = vmatprep.mubr.msk.f32.mxu1 %vm94_vm0, %v1060_v27 }
  0x3e   :  { %832 = vmatpush1.bf16.msra.mxu0 %v1156_v28  ;;  %249 = vmatmul.mubr.f32.gmra.mrb[2].mxu1 %v1109_v57 }
  0x3f   :  { %859 = vmatpush1.bf16.msra.mxu1 %v1035_v11  ;;  %833 = vmatprep.subr.bf16.mxu0 %v991_v0  ;;  %v268_v11 = vld [vmem:[#allocation2 + $0x168] sm:$0xff] }
  0x40   :  { %860 = vmatprep.subr.bf16.mxu1 %v991_v0  ;;  %752 = vmatprep.mubr.msk.f32.mxu0 %vm94_vm0, %v287_v35  ;;  %v1188_v44 = vpack.c.bf16 %v268_v11, %v267_v43 }
  0x41   :  { %763 = vmatprep.mubr.msk.f32.mxu1 %vm94_vm0, %v441_v4 }
  0x42   :  { %835 = vmatpush1.bf16.msra.mxu0 %v1170_v37 }
  0x43   :  { %862 = vmatpush1.bf16.msra.mxu1 %v1043_v17  ;;  %836 = vmatprep.subr.bf16.mxu0 %v991_v0  ;;  %v1194_v17 = vpack.c.bf16 %v270_v46, %v269_v45 }
  0x44   :  { %863 = vmatprep.subr.bf16.mxu1 %v991_v0 }
  0x46   :  { %838 = vmatpush1.bf16.msra.mxu0 %v1182_v40 }
  0x47   :  { %865 = vmatpush1.bf16.msra.mxu1 %v1051_v23  ;;  %839 = vmatprep.subr.bf16.mxu0 %v991_v0  ;;  %v1200_v23 = vpack.c.bf16 %v272_v50, %v271_v49 }
  0x48   :  { %866 = vmatprep.subr.bf16.mxu1 %v991_v0 }
  0x4a   :  { %841 = vmatpush1.bf16.msra.mxu0 %v1188_v44 }
  0x4b   :  { %868 = vmatpush1.bf16.msra.mxu1 %v1072_v34  ;;  %842 = vmatprep.subr.bf16.mxu0 %v991_v0  ;;  %v1206_v34 = vpack.c.bf16 %v274_v52, %v273_v51 }
  0x4c   :  { %869 = vmatprep.subr.bf16.mxu1 %v991_v0 }
  0x4e   :  { %844 = vmatpush1.bf16.msra.mxu0 %v1194_v17 }
  0x4f   :  { %871 = vmatpush1.bf16.msra.mxu1 %v1084_v41  ;;  %845 = vmatprep.subr.bf16.mxu0 %v991_v0  ;;  %v254_v41 = vld [vmem:[%s1340_s0] sm:$0xfc] }
  0x50   :  { %872 = vmatprep.subr.bf16.mxu1 %v991_v0  ;;  %v282_v62 = vrot.slane %v254_v41, 2 }
  0x52   :  { %847 = vmatpush1.bf16.msra.mxu0 %v1200_v23  ;;  %v284_v57 = vsel %vm281_vm2, %v282_v62, %v283_v63 }
  0x53   :  { %874 = vmatpush1.bf16.msra.mxu1 %v1092_v47  ;;  %848 = vmatprep.subr.bf16.mxu0 %v991_v0  ;;  %v257_v47 = vld [vmem:[%s1340_s0 + $0x28] sm:$0x3] }
  0x54   :  { %875 = vmatprep.subr.bf16.mxu1 %v991_v0  ;;  %v290_v7 = vrot.slane %v257_v47, 2 }
  0x56   :  { %850 = vmatpush1.bf16.msra.mxu0 %v1206_v34  ;;  %v291_v19 = vsel %vm281_vm2, %v286_v26, %v290_v7 }
  0x57   :  { %877 = vmatpush1.bf16.msra.mxu1 %v1100_v53  ;;  %851 = vmatprep.subr.bf16.mxu0 %v991_v0  ;;  %v761_v53 = vld [vmem:[%s1340_s0 + $0x50] sm:$0x1] }
  0x58   :  { %878 = vmatprep.subr.bf16.mxu1 %v991_v0  ;;  %v442_v15 = vrot.slane %v761_v53, 1 }
  0x5a   :  { %853 = vmatpush1.bf16.msra.mxu0 %v1226_v60  ;;  %v443_v27 = vsel %vm81_vm1, %v437_v3, %v442_v15 }
  0x5b   :  { %880 = vmatpush1.bf16.msra.mxu1 %v1116_v61  ;;  %881 = vmatprep.subr.bf16.mxu0 %v991_v0  ;;  %v289_v61 = vsel %vm281_vm2, %v283_v63, %v288_v9 }
  0x5c   :  { %908 = vmatprep.subr.bf16.mxu1 %v991_v0 }
  0x5d   :  { %363 = vmatmul.mubr.f32.vlgmr.msra.gmra.mrb[4].mxu0 %v284_v57 }
  0x5e   :  { %883 = vmatpush1.bf16.msra.mxu0 %v1032_v8  ;;  %517 = vmatmul.mubr.f32.vlgmr.msra.gmra.mrb[4].mxu1 %v438_v14  ;;  %v756_v8 = vld [vmem:[%s1340_s0 + $0x38] sm:$0xff] }
  0x5f   :  { %910 = vmatpush1.bf16.msra.mxu1 %v1135_v13  ;;  %753 = vmatprep.mubr.msk.f32.mxu0 %vm94_vm0, %v291_v19  ;;  %v638_v13 = vsel %vm281_vm2, %v636_v22, %v637_v24 }
  0x60   :  { %884 = vmatprep.subr.bf16.mxu0 %v991_v0  ;;  %911 = vmatprep.subr.bf16.mxu1 %v991_v0 }
  0x61   :  { %368 = vmatmul.mubr.f32.gmra.mrb[6].mxu0 %v289_v61  ;;  %764 = vmatprep.mubr.msk.f32.mxu1 %vm94_vm0, %v445_v21 }
  0x62   :  { %886 = vmatpush1.bf16.msra.mxu0 %v1039_v12  ;;  %522 = vmatmul.mubr.f32.gmra.mrb[6].mxu1 %v443_v27  ;;  %v767_v12 = vld [vmem:[%s1340_s0 + $0x30] sm:$0xfc] }
  0x63   :  { %913 = vmatpush1.bf16.msra.mxu1 %v1156_v28  ;;  %887 = vmatprep.subr.bf16.mxu0 %v991_v0 }
  0x64   :  { %914 = vmatprep.subr.bf16.mxu1 %v991_v0  ;;  %765 = vmatprep.mubr.msk.f32.mxu0 %vm94_vm0, %v756_v8 }
  0x65   :  { %771 = vmatprep.mubr.msk.f32.mxu1 %vm94_vm0, %v638_v13 }
  0x66   :  { %889 = vmatpush1.bf16.msra.mxu0 %v1047_v18  ;;  %v770_v18 = vld [vmem:[%s1340_s0 + $0x58] sm:$0x3] }
  0x67   :  { %916 = vmatpush1.bf16.msra.mxu1 %v1170_v37  ;;  %890 = vmatprep.subr.bf16.mxu0 %v991_v0 }
  0x68   :  { %917 = vmatprep.subr.bf16.mxu1 %v991_v0 }
  0x6a   :  { %892 = vmatpush1.bf16.msra.mxu0 %v1055_v25  ;;  %v633_v25 = vrot.slane %v767_v12, 2 }
  0x6b   :  { %919 = vmatpush1.bf16.msra.mxu1 %v1182_v40  ;;  %893 = vmatprep.subr.bf16.mxu0 %v991_v0 }
  0x6c   :  { %920 = vmatprep.subr.bf16.mxu1 %v991_v0 }
  0x6e   :  { %895 = vmatpush1.bf16.msra.mxu0 %v1079_v36  ;;  %v634_v36 = vrot.slane %v1217_v58, 2 }
  0x6f   :  { %922 = vmatpush1.bf16.msra.mxu1 %v1188_v44  ;;  %896 = vmatprep.subr.bf16.mxu0 %v991_v0 }
  0x70   :  { %923 = vmatprep.subr.bf16.mxu1 %v991_v0  ;;  %v635_v26 = vsel %vm281_vm2, %v633_v25, %v634_v36 }
  0x72   :  { %898 = vmatpush1.bf16.msra.mxu0 %v1088_v42  ;;  %v641_v42 = vrot.slane %v770_v18, 2 }
  0x73   :  { %925 = vmatpush1.bf16.msra.mxu1 %v1194_v17  ;;  %899 = vmatprep.subr.bf16.mxu0 %v991_v0 }
  0x74   :  { %926 = vmatprep.subr.bf16.mxu1 %v991_v0  ;;  %v642_v29 = vsel %vm281_vm2, %v637_v24, %v641_v42 }
  0x76   :  { %901 = vmatpush1.bf16.msra.mxu0 %v1096_v48  ;;  %v769_v48 = vld [vmem:[%s1340_s0 + $0x50] sm:$0x3] }
  0x77   :  { %928 = vmatpush1.bf16.msra.mxu1 %v1200_v23  ;;  %902 = vmatprep.subr.bf16.mxu0 %v991_v0  ;;  %v639_v28 = vrot.slane %v769_v48, 2 }
  0x78   :  { %929 = vmatprep.subr.bf16.mxu1 %v991_v0 }
  0x7a   :  { %904 = vmatpush1.bf16.msra.mxu0 %v1104_v55  ;;  %v755_v55 = vld [vmem:[%s1340_s0 + $0x30] sm:$0xff] }
  0x7b   :  { %931 = vmatpush1.bf16.msra.mxu1 %v1206_v34  ;;  %905 = vmatprep.subr.bf16.mxu0 %v991_v0 }
  0x7c   :  { %932 = vmatprep.subr.bf16.mxu1 %v991_v0  ;;  %v640_v0 = vsel %vm281_vm2, %v634_v36, %v639_v28 }
  0x7e   :  { %907 = vmatpush1.bf16.msra.mxu0 %v1124_v2 }
  0x7f   :  { %934 = vmatpush1.bf16.msra.mxu1 %v1226_v60 }
  0x81   :  { %597 = vmatmul.mubr.f32.vlgmr.msra.gmra.mrb[8].mxu0 %v755_v55 }
  0x82   :  { %714 = vmatmul.mubr.f32.vlgmr.msra.gmra.mrb[8].mxu1 %v635_v26  ;;  %766 = vmatprep.mubr.msk.f32.mxu0 %vm94_vm0, %v1145_v20  ;;  %v754_v20 = vld [vmem:[%s1342_s2] ss:$0 sm:$0xff]  ;;  %s992_s2 = smov [#allocation5]  }
  0x83   :  { %772 = vmatprep.mubr.msk.f32.mxu1 %vm94_vm0, %v642_v29  ;;  %s736_s21 = sshll.u32 %s992_s2, 4  ;;  %s737_s21 = int_to_ptr.vmem [resolvable:$true] %s736_s21 }
  0x84   :  { %s962_s24 = scalar_lea.vmem %s737_s21, 512  ;;  %p967_p9 = scmp.lt.s32.totalorder %s737_s21, %s737_s21 }
  0x85   :  { %602 = vmatmul.mubr.f32.gmra.mrb[10].mxu0 %v1217_v58  ;;  %p963_p8 = scmp.ne.s32.totalorder %s737_s21, %s962_s24  ;;  %p968_p10 = scmp.lt.s32.totalorder %s962_s24, %s962_s24 }
  0x86   :  { %719 = vmatmul.mubr.f32.gmra.mrb[10].mxu1 %v640_v0 }
  0x87   :  { %p969_p11 = por %p968_p10, %p967_p9 }
  0x89   :  { %p970_p12 = pnand %p969_p11, %p963_p8 }
 0x10c   :  { %v165_v2 = vpop.f32.mrb[0].mxu0 }
 0x10d   :  { %v167_v30 = vpop.f32.mrb[1].mxu0  ;;  %v245_v31 = vpop.f32.mrb[0].mxu1 }
 0x10e   :  { %v246_v33 = vadd.f32 %v245_v31, %v165_v2  ;;  %v247_v32 = vpop.f32.mrb[1].mxu1 }
 0x110   :  { %v170_v35 = vpop.f32.mrb[2].mxu0 }
 0x111   :  { %v172_v37 = vpop.f32.mrb[3].mxu0  ;;  %v250_v4 = vpop.f32.mrb[2].mxu1 }
 0x112   :  { %v251_v38 = vadd.f32 %v250_v4, %v170_v35  ;;  %v252_v39 = vpop.f32.mrb[3].mxu1 }
 0x130   :  { %v364_v40 = vpop.f32.mrb[4].mxu0 }
 0x131   :  { %v373_v43 = vadd.f32 %v364_v40, %v246_v33  ;;  %v366_v11 = vpop.f32.mrb[5].mxu0  ;;  %v518_v44 = vpop.f32.mrb[4].mxu1 }
 0x132   :  { %v520_v45 = vpop.f32.mrb[5].mxu1 }
 0x133   :  { %v381_v46 = vadd.f32 %v754_v20, %v373_v43 }
 0x134   :  { %v369_v17 = vpop.f32.mrb[6].mxu0 }
 0x135   :  { %383 = vst [vmem:[#allocation5] sm:$0xff] %v381_v46  ;;  %v374_v49 = vadd.f32 %v369_v17, %v251_v38  ;;  %v371_v50 = vpop.f32.mrb[7].mxu0  ;;  %v523_v23 = vpop.f32.mrb[6].mxu1 }
 0x136   :  { %v525_v51 = vpop.f32.mrb[7].mxu1 }
 0x137   :  { %v382_v52 = vadd.f32 %v754_v20, %v374_v49 }
 0x139   :  { %384 = vst [vmem:[#allocation5 + $0x8] sm:$0xff] %v382_v52 }
 0x154   :  { %v598_v34 = vpop.f32.mrb[8].mxu0 }
 0x155   :  { %v599_v54 = vadd.f32 %v598_v34, %v518_v44  ;;  %v600_v56 = vpop.f32.mrb[9].mxu0  ;;  %v715_v41 = vpop.f32.mrb[8].mxu1 }
 0x156   :  { %v717_v58 = vpop.f32.mrb[9].mxu1 }
 0x157   :  { %v724_v59 = vadd.f32 %v715_v41, %v599_v54 }
 0x158   :  { %v603_v47 = vpop.f32.mrb[10].mxu0 }
 0x159   :  { %v726_v60 = vadd.f32 %v754_v20, %v724_v59  ;;  %v604_v62 = vadd.f32 %v603_v47, %v523_v23  ;;  %v605_v63 = vpop.f32.mrb[11].mxu0  ;;  %v720_v1 = vpop.f32.mrb[10].mxu1 }
 0x15a   :  { %v722_v3 = vpop.f32.mrb[11].mxu1 }
 0x15b   :  { %729 = vst [vmem:[#allocation5 + $0x10] sm:$0xff] %v726_v60  ;;  %v725_v5 = vadd.f32 %v720_v1, %v604_v62 }
 0x15d   :  { %v727_v6 = vadd.f32 %v754_v20, %v725_v5 }
 0x15f   :  { %730 = vst [vmem:[#allocation5 + $0x18] sm:$0xff] %v727_v6 }
 0x160   :  { %973 = shalt.err (!%p970_p12)
}
 0x161   :  { %s974_s26 = scalar_lea.hbm %s1343_s3, 512 }
 0x162   :  { %p975_p13 = scmp.ne.s32.totalorder %s1343_s3, %s974_s26  ;;  %p978_p0 = scmp.lt.u32.totalorder %s974_s26, %s1343_s3 }
 0x164   :  { %p980_p1 = pnand %p978_p0, %p975_p13 }
 0x166   :  { %983 = shalt.err (!%p980_p1)
}
 0x167   :  { %742 = dma.vmem_to_hbm [thread:$0]  %s737_s21, 512, %s1343_s3, [#allocation4], %s989_s22, %s989_s22, %s990_s23  }
 0x168   :  { %986 = dma.done.wait [#allocation4], 512  }
 0x169   :  { %987 = vsyncadd [#allocation4], 4294966784 }
 0x16a   :  { %746 = vsyncpa [#allocation3], 1 }
 0x16b   :  { %747 = vsyncpa [#allocation4], 1 }

</bundles_post_ra>
